<compile_context>
chip_gen: v6e
topology: v6e:2x2x1
jax: 0.10.0
libtpu: 0.0.40
codegen_flags: <defaults>
</compile_context>

<pallas_src>
import jax
import jax.numpy as jnp
from jax.experimental import pallas as pl
from jax.experimental.pallas import tpu as pltpu


# Feature sizes of the torch module: 5 -> 5 -> 3 -> 2.
_D_IN, _D_H1, _D_H2, _D_OUT = 5, 5, 3, 2


def _mlp_kernel(w1_ref, b1_ref, w2_ref, b2_ref, w3_ref, b3_ref, x_ref, o_ref):
    """One batch tile, feature-major.

    x_ref : (5, TILE_B) VMEM  -- batch on the 128-lane axis (lane-dense)
    o_ref : (2, TILE_B) VMEM
    w*/b* : SMEM; read as scalars and broadcast-FMA'd on the VPU.
    """
    # 5 feature rows of the current batch tile, each (1, TILE_B) f32.
    x = [x_ref[k:k + 1, :].astype(jnp.float32) for k in range(_D_IN)]

    # fc1 (5 -> 5) + ReLU : 25 broadcast-FMAs
    h1 = []
    for j in range(_D_H1):
        s = x[0] * w1_ref[0, j]
        for k in range(1, _D_IN):
            s = s + x[k] * w1_ref[k, j]
        h1.append(jnp.maximum(s + b1_ref[j], 0.0))

    # fc2 (5 -> 3) + ReLU : 15 broadcast-FMAs
    h2 = []
    for j in range(_D_H2):
        s = h1[0] * w2_ref[0, j]
        for k in range(1, _D_H1):
            s = s + h1[k] * w2_ref[k, j]
        h2.append(jnp.maximum(s + b2_ref[j], 0.0))

    # fc3 (3 -> 2) : 6 broadcast-FMAs, lane-dense row stores
    for j in range(_D_OUT):
        s = h2[0] * w3_ref[0, j]
        for k in range(1, _D_H2):
            s = s + h2[k] * w3_ref[k, j]
        o_ref[j:j + 1, :] = (s + b3_ref[j]).astype(o_ref.dtype)


def net_forward(x, params, *, tile_b=8192):
    """x: (B, 5) float32/bf16. Returns (B, 2) float32."""
    B = x.shape[0]
    assert x.shape[1] == _D_IN, x.shape

    # TILE_B: multiple of 128, clamped to the (padded) batch, sized so that the
    # double-buffered x/out tiles stay well under VMEM on v7x (64 MiB) as well
    # as v5e/v6e (128 MiB): 8192 rows -> ~0.5 MiB of pipelined VMEM.
    tile_b = min(tile_b, pl.cdiv(B, 128) * 128)
    pad_b = pl.cdiv(B, tile_b) * tile_b

    # Feature-major (lane-dense) layout; transpose/pad are cheap XLA ops.
    x_t = x.T                                   # (5, B)
    if pad_b != B:
        x_t = jnp.pad(x_t, ((0, 0), (0, pad_b - B)))

    smem = pl.BlockSpec(memory_space=pltpu.MemorySpace.SMEM)

    out_t = pl.pallas_call(
        _mlp_kernel,
        out_shape=jax.ShapeDtypeStruct((_D_OUT, pad_b), jnp.float32),
        grid=(pad_b // tile_b,),
        in_specs=[
            smem, smem, smem, smem, smem, smem,          # w1,b1,w2,b2,w3,b3 (resident)
            pl.BlockSpec((_D_IN, tile_b), lambda i: (0, i)),
        ],
        out_specs=pl.BlockSpec((_D_OUT, tile_b), lambda i: (0, i)),
        compiler_params=pltpu.CompilerParams(
            dimension_semantics=("parallel",)),          # shard batch tiles across TCs (v7x)
    )(params["w1"], params["b1"], params["w2"], params["b2"],
      params["w3"], params["b3"], x_t)

    return out_t.T[:B]                          # (B, 2)


def init_params(key):
    """Init mimicking torch.nn.Linear default U[-1/sqrt(fan_in), +1/sqrt(fan_in)]."""
    def linear_init(key, fan_in, fan_out):
        kw, kb = jax.random.split(key)
        bound = 1.0 / jnp.sqrt(fan_in)
        # Stored as (in_features, out_features) for x @ W.
        w = jax.random.uniform(kw, (fan_in, fan_out), jnp.float32, -bound, bound)
        b = jax.random.uniform(kb, (fan_out,), jnp.float32, -bound, bound)
        return w, b

    k1, k2, k3 = jax.random.split(key, 3)
    w1, b1 = linear_init(k1, _D_IN, _D_H1)
    w2, b2 = linear_init(k2, _D_H1, _D_H2)
    w3, b3 = linear_init(k3, _D_H2, _D_OUT)
    return {"w1": w1, "b1": b1, "w2": w2, "b2": b2, "w3": w3, "b3": b3}


def net_forward_ref(x, params):
    """Pure-JAX reference for correctness check."""
    h = jnp.maximum(x @ params["w1"] + params["b1"], 0.0)
    h = jnp.maximum(h @ params["w2"] + params["b2"], 0.0)
    return h @ params["w3"] + params["b3"]


if __name__ == "__main__":
    key = jax.random.PRNGKey(0)
    kp, kx = jax.random.split(key)
    params = init_params(kp)

    # Small batch (single tile, padded 8 -> 128).
    x = jax.random.normal(kx, (8, _D_IN), jnp.float32)
    out = jax.block_until_ready(net_forward(x, params))
    ref = net_forward_ref(x, params)
    assert out.shape == (8, _D_OUT), out.shape
    assert jnp.allclose(out, ref, atol=1e-5, rtol=1e-5), "mismatch vs reference (small)"

    # Multi-tile batch that is NOT a multiple of the tile size (exercises the
    # pipelined grid + tail padding path).
    x_big = jax.random.normal(kx, (1000, _D_IN), jnp.float32)
    out_big = jax.block_until_ready(net_forward(x_big, params, tile_b=512))
    ref_big = net_forward_ref(x_big, params)
    assert out_big.shape == (1000, _D_OUT), out_big.shape
    assert jnp.allclose(out_big, ref_big, atol=1e-4, rtol=1e-4), "mismatch vs reference (big)"

    print("KERNEL_OK")
</pallas_src>

<mosaic_0001>
module attributes {stable_mosaic.version = 11 : i64} {
  func.func @_mlp_kernel(%arg0: i32, %arg1: memref<5x5xf32, #tpu.memory_space<smem>>, %arg2: memref<5xf32, #tpu.memory_space<smem>>, %arg3: memref<5x3xf32, #tpu.memory_space<smem>>, %arg4: memref<3xf32, #tpu.memory_space<smem>>, %arg5: memref<3x2xf32, #tpu.memory_space<smem>>, %arg6: memref<2xf32, #tpu.memory_space<smem>>, %arg7: memref<5x128xf32, #tpu.memory_space<vmem>>, %arg8: memref<2x128xf32, #tpu.memory_space<vmem>>) attributes {dimension_semantics = [#tpu.dimension_semantics<parallel>], iteration_bounds = array<i64: 1>, scalar_prefetch = 0 : i64, scratch_operands = 0 : i64, tpu.core_type = #tpu.core_type<tc>, window_params = [{transform_indices = @transform_0, window_bounds = array<i64: 5, 5>}, {transform_indices = @transform_1, window_bounds = array<i64: 5>}, {transform_indices = @transform_2, window_bounds = array<i64: 5, 3>}, {transform_indices = @transform_3, window_bounds = array<i64: 3>}, {transform_indices = @transform_4, window_bounds = array<i64: 3, 2>}, {transform_indices = @transform_5, window_bounds = array<i64: 2>}, {transform_indices = @transform_6, window_bounds = array<i64: 5, 128>}, {transform_indices = @transform_7, window_bounds = array<i64: 2, 128>}]} {
    %c0 = arith.constant 0 : index
    %c0_0 = arith.constant 0 : index
    %0 = vector.load %arg7[%c0, %c0_0] : memref<5x128xf32, #tpu.memory_space<vmem>>, vector<1x128xf32>
    %c1 = arith.constant 1 : index
    %c0_1 = arith.constant 0 : index
    %1 = vector.load %arg7[%c1, %c0_1] : memref<5x128xf32, #tpu.memory_space<vmem>>, vector<1x128xf32>
    %c2 = arith.constant 2 : index
    %c0_2 = arith.constant 0 : index
    %2 = vector.load %arg7[%c2, %c0_2] : memref<5x128xf32, #tpu.memory_space<vmem>>, vector<1x128xf32>
    %c3 = arith.constant 3 : index
    %c0_3 = arith.constant 0 : index
    %3 = vector.load %arg7[%c3, %c0_3] : memref<5x128xf32, #tpu.memory_space<vmem>>, vector<1x128xf32>
    %c4 = arith.constant 4 : index
    %c0_4 = arith.constant 0 : index
    %4 = vector.load %arg7[%c4, %c0_4] : memref<5x128xf32, #tpu.memory_space<vmem>>, vector<1x128xf32>
    %c0_5 = arith.constant 0 : index
    %c0_6 = arith.constant 0 : index
    %5 = memref.load %arg1[%c0_5, %c0_6] : memref<5x5xf32, #tpu.memory_space<smem>>
    %6 = vector.broadcast %5 : f32 to vector<1x128xf32>
    %7 = arith.mulf %0, %6 : vector<1x128xf32>
    %c1_7 = arith.constant 1 : index
    %c0_8 = arith.constant 0 : index
    %8 = memref.load %arg1[%c1_7, %c0_8] : memref<5x5xf32, #tpu.memory_space<smem>>
    %9 = vector.broadcast %8 : f32 to vector<1x128xf32>
    %10 = arith.mulf %1, %9 : vector<1x128xf32>
    %11 = arith.addf %7, %10 : vector<1x128xf32>
    %c2_9 = arith.constant 2 : index
    %c0_10 = arith.constant 0 : index
    %12 = memref.load %arg1[%c2_9, %c0_10] : memref<5x5xf32, #tpu.memory_space<smem>>
    %13 = vector.broadcast %12 : f32 to vector<1x128xf32>
    %14 = arith.mulf %2, %13 : vector<1x128xf32>
    %15 = arith.addf %11, %14 : vector<1x128xf32>
    %c3_11 = arith.constant 3 : index
    %c0_12 = arith.constant 0 : index
    %16 = memref.load %arg1[%c3_11, %c0_12] : memref<5x5xf32, #tpu.memory_space<smem>>
    %17 = vector.broadcast %16 : f32 to vector<1x128xf32>
    %18 = arith.mulf %3, %17 : vector<1x128xf32>
    %19 = arith.addf %15, %18 : vector<1x128xf32>
    %c4_13 = arith.constant 4 : index
    %c0_14 = arith.constant 0 : index
    %20 = memref.load %arg1[%c4_13, %c0_14] : memref<5x5xf32, #tpu.memory_space<smem>>
    %21 = vector.broadcast %20 : f32 to vector<1x128xf32>
    %22 = arith.mulf %4, %21 : vector<1x128xf32>
    %23 = arith.addf %19, %22 : vector<1x128xf32>
    %c0_15 = arith.constant 0 : index
    %24 = memref.load %arg2[%c0_15] : memref<5xf32, #tpu.memory_space<smem>>
    %25 = vector.broadcast %24 : f32 to vector<1x128xf32>
    %26 = arith.addf %23, %25 : vector<1x128xf32>
    %cst = arith.constant 0.000000e+00 : f32
    %27 = vector.broadcast %cst : f32 to vector<1x128xf32>
    %28 = arith.maximumf %26, %27 : vector<1x128xf32>
    %c0_16 = arith.constant 0 : index
    %c1_17 = arith.constant 1 : index
    %29 = memref.load %arg1[%c0_16, %c1_17] : memref<5x5xf32, #tpu.memory_space<smem>>
    %30 = vector.broadcast %29 : f32 to vector<1x128xf32>
    %31 = arith.mulf %0, %30 : vector<1x128xf32>
    %c1_18 = arith.constant 1 : index
    %c1_19 = arith.constant 1 : index
    %32 = memref.load %arg1[%c1_18, %c1_19] : memref<5x5xf32, #tpu.memory_space<smem>>
    %33 = vector.broadcast %32 : f32 to vector<1x128xf32>
    %34 = arith.mulf %1, %33 : vector<1x128xf32>
    %35 = arith.addf %31, %34 : vector<1x128xf32>
    %c2_20 = arith.constant 2 : index
    %c1_21 = arith.constant 1 : index
    %36 = memref.load %arg1[%c2_20, %c1_21] : memref<5x5xf32, #tpu.memory_space<smem>>
    %37 = vector.broadcast %36 : f32 to vector<1x128xf32>
    %38 = arith.mulf %2, %37 : vector<1x128xf32>
    %39 = arith.addf %35, %38 : vector<1x128xf32>
    %c3_22 = arith.constant 3 : index
    %c1_23 = arith.constant 1 : index
    %40 = memref.load %arg1[%c3_22, %c1_23] : memref<5x5xf32, #tpu.memory_space<smem>>
    %41 = vector.broadcast %40 : f32 to vector<1x128xf32>
    %42 = arith.mulf %3, %41 : vector<1x128xf32>
    %43 = arith.addf %39, %42 : vector<1x128xf32>
    %c4_24 = arith.constant 4 : index
    %c1_25 = arith.constant 1 : index
    %44 = memref.load %arg1[%c4_24, %c1_25] : memref<5x5xf32, #tpu.memory_space<smem>>
    %45 = vector.broadcast %44 : f32 to vector<1x128xf32>
    %46 = arith.mulf %4, %45 : vector<1x128xf32>
    %47 = arith.addf %43, %46 : vector<1x128xf32>
    %c1_26 = arith.constant 1 : index
    %48 = memref.load %arg2[%c1_26] : memref<5xf32, #tpu.memory_space<smem>>
    %49 = vector.broadcast %48 : f32 to vector<1x128xf32>
    %50 = arith.addf %47, %49 : vector<1x128xf32>
    %cst_27 = arith.constant 0.000000e+00 : f32
    %51 = vector.broadcast %cst_27 : f32 to vector<1x128xf32>
    %52 = arith.maximumf %50, %51 : vector<1x128xf32>
    %c0_28 = arith.constant 0 : index
    %c2_29 = arith.constant 2 : index
    %53 = memref.load %arg1[%c0_28, %c2_29] : memref<5x5xf32, #tpu.memory_space<smem>>
    %54 = vector.broadcast %53 : f32 to vector<1x128xf32>
    %55 = arith.mulf %0, %54 : vector<1x128xf32>
    %c1_30 = arith.constant 1 : index
    %c2_31 = arith.constant 2 : index
    %56 = memref.load %arg1[%c1_30, %c2_31] : memref<5x5xf32, #tpu.memory_space<smem>>
    %57 = vector.broadcast %56 : f32 to vector<1x128xf32>
    %58 = arith.mulf %1, %57 : vector<1x128xf32>
    %59 = arith.addf %55, %58 : vector<1x128xf32>
    %c2_32 = arith.constant 2 : index
    %c2_33 = arith.constant 2 : index
    %60 = memref.load %arg1[%c2_32, %c2_33] : memref<5x5xf32, #tpu.memory_space<smem>>
    %61 = vector.broadcast %60 : f32 to vector<1x128xf32>
    %62 = arith.mulf %2, %61 : vector<1x128xf32>
    %63 = arith.addf %59, %62 : vector<1x128xf32>
    %c3_34 = arith.constant 3 : index
    %c2_35 = arith.constant 2 : index
    %64 = memref.load %arg1[%c3_34, %c2_35] : memref<5x5xf32, #tpu.memory_space<smem>>
    %65 = vector.broadcast %64 : f32 to vector<1x128xf32>
    %66 = arith.mulf %3, %65 : vector<1x128xf32>
    %67 = arith.addf %63, %66 : vector<1x128xf32>
    %c4_36 = arith.constant 4 : index
    %c2_37 = arith.constant 2 : index
    %68 = memref.load %arg1[%c4_36, %c2_37] : memref<5x5xf32, #tpu.memory_space<smem>>
    %69 = vector.broadcast %68 : f32 to vector<1x128xf32>
    %70 = arith.mulf %4, %69 : vector<1x128xf32>
    %71 = arith.addf %67, %70 : vector<1x128xf32>
    %c2_38 = arith.constant 2 : index
    %72 = memref.load %arg2[%c2_38] : memref<5xf32, #tpu.memory_space<smem>>
    %73 = vector.broadcast %72 : f32 to vector<1x128xf32>
    %74 = arith.addf %71, %73 : vector<1x128xf32>
    %cst_39 = arith.constant 0.000000e+00 : f32
    %75 = vector.broadcast %cst_39 : f32 to vector<1x128xf32>
    %76 = arith.maximumf %74, %75 : vector<1x128xf32>
    %c0_40 = arith.constant 0 : index
    %c3_41 = arith.constant 3 : index
    %77 = memref.load %arg1[%c0_40, %c3_41] : memref<5x5xf32, #tpu.memory_space<smem>>
    %78 = vector.broadcast %77 : f32 to vector<1x128xf32>
    %79 = arith.mulf %0, %78 : vector<1x128xf32>
    %c1_42 = arith.constant 1 : index
    %c3_43 = arith.constant 3 : index
    %80 = memref.load %arg1[%c1_42, %c3_43] : memref<5x5xf32, #tpu.memory_space<smem>>
    %81 = vector.broadcast %80 : f32 to vector<1x128xf32>
    %82 = arith.mulf %1, %81 : vector<1x128xf32>
    %83 = arith.addf %79, %82 : vector<1x128xf32>
    %c2_44 = arith.constant 2 : index
    %c3_45 = arith.constant 3 : index
    %84 = memref.load %arg1[%c2_44, %c3_45] : memref<5x5xf32, #tpu.memory_space<smem>>
    %85 = vector.broadcast %84 : f32 to vector<1x128xf32>
    %86 = arith.mulf %2, %85 : vector<1x128xf32>
    %87 = arith.addf %83, %86 : vector<1x128xf32>
    %c3_46 = arith.constant 3 : index
    %c3_47 = arith.constant 3 : index
    %88 = memref.load %arg1[%c3_46, %c3_47] : memref<5x5xf32, #tpu.memory_space<smem>>
    %89 = vector.broadcast %88 : f32 to vector<1x128xf32>
    %90 = arith.mulf %3, %89 : vector<1x128xf32>
    %91 = arith.addf %87, %90 : vector<1x128xf32>
    %c4_48 = arith.constant 4 : index
    %c3_49 = arith.constant 3 : index
    %92 = memref.load %arg1[%c4_48, %c3_49] : memref<5x5xf32, #tpu.memory_space<smem>>
    %93 = vector.broadcast %92 : f32 to vector<1x128xf32>
    %94 = arith.mulf %4, %93 : vector<1x128xf32>
    %95 = arith.addf %91, %94 : vector<1x128xf32>
    %c3_50 = arith.constant 3 : index
    %96 = memref.load %arg2[%c3_50] : memref<5xf32, #tpu.memory_space<smem>>
    %97 = vector.broadcast %96 : f32 to vector<1x128xf32>
    %98 = arith.addf %95, %97 : vector<1x128xf32>
    %cst_51 = arith.constant 0.000000e+00 : f32
    %99 = vector.broadcast %cst_51 : f32 to vector<1x128xf32>
    %100 = arith.maximumf %98, %99 : vector<1x128xf32>
    %c0_52 = arith.constant 0 : index
    %c4_53 = arith.constant 4 : index
    %101 = memref.load %arg1[%c0_52, %c4_53] : memref<5x5xf32, #tpu.memory_space<smem>>
    %102 = vector.broadcast %101 : f32 to vector<1x128xf32>
    %103 = arith.mulf %0, %102 : vector<1x128xf32>
    %c1_54 = arith.constant 1 : index
    %c4_55 = arith.constant 4 : index
    %104 = memref.load %arg1[%c1_54, %c4_55] : memref<5x5xf32, #tpu.memory_space<smem>>
    %105 = vector.broadcast %104 : f32 to vector<1x128xf32>
    %106 = arith.mulf %1, %105 : vector<1x128xf32>
    %107 = arith.addf %103, %106 : vector<1x128xf32>
    %c2_56 = arith.constant 2 : index
    %c4_57 = arith.constant 4 : index
    %108 = memref.load %arg1[%c2_56, %c4_57] : memref<5x5xf32, #tpu.memory_space<smem>>
    %109 = vector.broadcast %108 : f32 to vector<1x128xf32>
    %110 = arith.mulf %2, %109 : vector<1x128xf32>
    %111 = arith.addf %107, %110 : vector<1x128xf32>
    %c3_58 = arith.constant 3 : index
    %c4_59 = arith.constant 4 : index
    %112 = memref.load %arg1[%c3_58, %c4_59] : memref<5x5xf32, #tpu.memory_space<smem>>
    %113 = vector.broadcast %112 : f32 to vector<1x128xf32>
    %114 = arith.mulf %3, %113 : vector<1x128xf32>
    %115 = arith.addf %111, %114 : vector<1x128xf32>
    %c4_60 = arith.constant 4 : index
    %c4_61 = arith.constant 4 : index
    %116 = memref.load %arg1[%c4_60, %c4_61] : memref<5x5xf32, #tpu.memory_space<smem>>
    %117 = vector.broadcast %116 : f32 to vector<1x128xf32>
    %118 = arith.mulf %4, %117 : vector<1x128xf32>
    %119 = arith.addf %115, %118 : vector<1x128xf32>
    %c4_62 = arith.constant 4 : index
    %120 = memref.load %arg2[%c4_62] : memref<5xf32, #tpu.memory_space<smem>>
    %121 = vector.broadcast %120 : f32 to vector<1x128xf32>
    %122 = arith.addf %119, %121 : vector<1x128xf32>
    %cst_63 = arith.constant 0.000000e+00 : f32
    %123 = vector.broadcast %cst_63 : f32 to vector<1x128xf32>
    %124 = arith.maximumf %122, %123 : vector<1x128xf32>
    %c0_64 = arith.constant 0 : index
    %c0_65 = arith.constant 0 : index
    %125 = memref.load %arg3[%c0_64, %c0_65] : memref<5x3xf32, #tpu.memory_space<smem>>
    %126 = vector.broadcast %125 : f32 to vector<1x128xf32>
    %127 = arith.mulf %28, %126 : vector<1x128xf32>
    %c1_66 = arith.constant 1 : index
    %c0_67 = arith.constant 0 : index
    %128 = memref.load %arg3[%c1_66, %c0_67] : memref<5x3xf32, #tpu.memory_space<smem>>
    %129 = vector.broadcast %128 : f32 to vector<1x128xf32>
    %130 = arith.mulf %52, %129 : vector<1x128xf32>
    %131 = arith.addf %127, %130 : vector<1x128xf32>
    %c2_68 = arith.constant 2 : index
    %c0_69 = arith.constant 0 : index
    %132 = memref.load %arg3[%c2_68, %c0_69] : memref<5x3xf32, #tpu.memory_space<smem>>
    %133 = vector.broadcast %132 : f32 to vector<1x128xf32>
    %134 = arith.mulf %76, %133 : vector<1x128xf32>
    %135 = arith.addf %131, %134 : vector<1x128xf32>
    %c3_70 = arith.constant 3 : index
    %c0_71 = arith.constant 0 : index
    %136 = memref.load %arg3[%c3_70, %c0_71] : memref<5x3xf32, #tpu.memory_space<smem>>
    %137 = vector.broadcast %136 : f32 to vector<1x128xf32>
    %138 = arith.mulf %100, %137 : vector<1x128xf32>
    %139 = arith.addf %135, %138 : vector<1x128xf32>
    %c4_72 = arith.constant 4 : index
    %c0_73 = arith.constant 0 : index
    %140 = memref.load %arg3[%c4_72, %c0_73] : memref<5x3xf32, #tpu.memory_space<smem>>
    %141 = vector.broadcast %140 : f32 to vector<1x128xf32>
    %142 = arith.mulf %124, %141 : vector<1x128xf32>
    %143 = arith.addf %139, %142 : vector<1x128xf32>
    %c0_74 = arith.constant 0 : index
    %144 = memref.load %arg4[%c0_74] : memref<3xf32, #tpu.memory_space<smem>>
    %145 = vector.broadcast %144 : f32 to vector<1x128xf32>
    %146 = arith.addf %143, %145 : vector<1x128xf32>
    %cst_75 = arith.constant 0.000000e+00 : f32
    %147 = vector.broadcast %cst_75 : f32 to vector<1x128xf32>
    %148 = arith.maximumf %146, %147 : vector<1x128xf32>
    %c0_76 = arith.constant 0 : index
    %c1_77 = arith.constant 1 : index
    %149 = memref.load %arg3[%c0_76, %c1_77] : memref<5x3xf32, #tpu.memory_space<smem>>
    %150 = vector.broadcast %149 : f32 to vector<1x128xf32>
    %151 = arith.mulf %28, %150 : vector<1x128xf32>
    %c1_78 = arith.constant 1 : index
    %c1_79 = arith.constant 1 : index
    %152 = memref.load %arg3[%c1_78, %c1_79] : memref<5x3xf32, #tpu.memory_space<smem>>
    %153 = vector.broadcast %152 : f32 to vector<1x128xf32>
    %154 = arith.mulf %52, %153 : vector<1x128xf32>
    %155 = arith.addf %151, %154 : vector<1x128xf32>
    %c2_80 = arith.constant 2 : index
    %c1_81 = arith.constant 1 : index
    %156 = memref.load %arg3[%c2_80, %c1_81] : memref<5x3xf32, #tpu.memory_space<smem>>
    %157 = vector.broadcast %156 : f32 to vector<1x128xf32>
    %158 = arith.mulf %76, %157 : vector<1x128xf32>
    %159 = arith.addf %155, %158 : vector<1x128xf32>
    %c3_82 = arith.constant 3 : index
    %c1_83 = arith.constant 1 : index
    %160 = memref.load %arg3[%c3_82, %c1_83] : memref<5x3xf32, #tpu.memory_space<smem>>
    %161 = vector.broadcast %160 : f32 to vector<1x128xf32>
    %162 = arith.mulf %100, %161 : vector<1x128xf32>
    %163 = arith.addf %159, %162 : vector<1x128xf32>
    %c4_84 = arith.constant 4 : index
    %c1_85 = arith.constant 1 : index
    %164 = memref.load %arg3[%c4_84, %c1_85] : memref<5x3xf32, #tpu.memory_space<smem>>
    %165 = vector.broadcast %164 : f32 to vector<1x128xf32>
    %166 = arith.mulf %124, %165 : vector<1x128xf32>
    %167 = arith.addf %163, %166 : vector<1x128xf32>
    %c1_86 = arith.constant 1 : index
    %168 = memref.load %arg4[%c1_86] : memref<3xf32, #tpu.memory_space<smem>>
    %169 = vector.broadcast %168 : f32 to vector<1x128xf32>
    %170 = arith.addf %167, %169 : vector<1x128xf32>
    %cst_87 = arith.constant 0.000000e+00 : f32
    %171 = vector.broadcast %cst_87 : f32 to vector<1x128xf32>
    %172 = arith.maximumf %170, %171 : vector<1x128xf32>
    %c0_88 = arith.constant 0 : index
    %c2_89 = arith.constant 2 : index
    %173 = memref.load %arg3[%c0_88, %c2_89] : memref<5x3xf32, #tpu.memory_space<smem>>
    %174 = vector.broadcast %173 : f32 to vector<1x128xf32>
    %175 = arith.mulf %28, %174 : vector<1x128xf32>
    %c1_90 = arith.constant 1 : index
    %c2_91 = arith.constant 2 : index
    %176 = memref.load %arg3[%c1_90, %c2_91] : memref<5x3xf32, #tpu.memory_space<smem>>
    %177 = vector.broadcast %176 : f32 to vector<1x128xf32>
    %178 = arith.mulf %52, %177 : vector<1x128xf32>
    %179 = arith.addf %175, %178 : vector<1x128xf32>
    %c2_92 = arith.constant 2 : index
    %c2_93 = arith.constant 2 : index
    %180 = memref.load %arg3[%c2_92, %c2_93] : memref<5x3xf32, #tpu.memory_space<smem>>
    %181 = vector.broadcast %180 : f32 to vector<1x128xf32>
    %182 = arith.mulf %76, %181 : vector<1x128xf32>
    %183 = arith.addf %179, %182 : vector<1x128xf32>
    %c3_94 = arith.constant 3 : index
    %c2_95 = arith.constant 2 : index
    %184 = memref.load %arg3[%c3_94, %c2_95] : memref<5x3xf32, #tpu.memory_space<smem>>
    %185 = vector.broadcast %184 : f32 to vector<1x128xf32>
    %186 = arith.mulf %100, %185 : vector<1x128xf32>
    %187 = arith.addf %183, %186 : vector<1x128xf32>
    %c4_96 = arith.constant 4 : index
    %c2_97 = arith.constant 2 : index
    %188 = memref.load %arg3[%c4_96, %c2_97] : memref<5x3xf32, #tpu.memory_space<smem>>
    %189 = vector.broadcast %188 : f32 to vector<1x128xf32>
    %190 = arith.mulf %124, %189 : vector<1x128xf32>
    %191 = arith.addf %187, %190 : vector<1x128xf32>
    %c2_98 = arith.constant 2 : index
    %192 = memref.load %arg4[%c2_98] : memref<3xf32, #tpu.memory_space<smem>>
    %193 = vector.broadcast %192 : f32 to vector<1x128xf32>
    %194 = arith.addf %191, %193 : vector<1x128xf32>
    %cst_99 = arith.constant 0.000000e+00 : f32
    %195 = vector.broadcast %cst_99 : f32 to vector<1x128xf32>
    %196 = arith.maximumf %194, %195 : vector<1x128xf32>
    %c0_100 = arith.constant 0 : index
    %c0_101 = arith.constant 0 : index
    %197 = memref.load %arg5[%c0_100, %c0_101] : memref<3x2xf32, #tpu.memory_space<smem>>
    %198 = vector.broadcast %197 : f32 to vector<1x128xf32>
    %199 = arith.mulf %148, %198 : vector<1x128xf32>
    %c1_102 = arith.constant 1 : index
    %c0_103 = arith.constant 0 : index
    %200 = memref.load %arg5[%c1_102, %c0_103] : memref<3x2xf32, #tpu.memory_space<smem>>
    %201 = vector.broadcast %200 : f32 to vector<1x128xf32>
    %202 = arith.mulf %172, %201 : vector<1x128xf32>
    %203 = arith.addf %199, %202 : vector<1x128xf32>
    %c2_104 = arith.constant 2 : index
    %c0_105 = arith.constant 0 : index
    %204 = memref.load %arg5[%c2_104, %c0_105] : memref<3x2xf32, #tpu.memory_space<smem>>
    %205 = vector.broadcast %204 : f32 to vector<1x128xf32>
    %206 = arith.mulf %196, %205 : vector<1x128xf32>
    %207 = arith.addf %203, %206 : vector<1x128xf32>
    %c0_106 = arith.constant 0 : index
    %208 = memref.load %arg6[%c0_106] : memref<2xf32, #tpu.memory_space<smem>>
    %209 = vector.broadcast %208 : f32 to vector<1x128xf32>
    %210 = arith.addf %207, %209 : vector<1x128xf32>
    %c0_107 = arith.constant 0 : index
    %c0_108 = arith.constant 0 : index
    %211 = vector.load %arg8[%c0_107, %c0_108] : memref<2x128xf32, #tpu.memory_space<vmem>>, vector<1x128xf32>
    tpu.vector_store %arg8[%c0_107, %c0_108], %210 {strides = array<i32>} : memref<2x128xf32, #tpu.memory_space<vmem>>, vector<1x128xf32>,
    %c0_109 = arith.constant 0 : index
    %c1_110 = arith.constant 1 : index
    %212 = memref.load %arg5[%c0_109, %c1_110] : memref<3x2xf32, #tpu.memory_space<smem>>
    %213 = vector.broadcast %212 : f32 to vector<1x128xf32>
    %214 = arith.mulf %148, %213 : vector<1x128xf32>
    %c1_111 = arith.constant 1 : index
    %c1_112 = arith.constant 1 : index
    %215 = memref.load %arg5[%c1_111, %c1_112] : memref<3x2xf32, #tpu.memory_space<smem>>
    %216 = vector.broadcast %215 : f32 to vector<1x128xf32>
    %217 = arith.mulf %172, %216 : vector<1x128xf32>
    %218 = arith.addf %214, %217 : vector<1x128xf32>
    %c2_113 = arith.constant 2 : index
    %c1_114 = arith.constant 1 : index
    %219 = memref.load %arg5[%c2_113, %c1_114] : memref<3x2xf32, #tpu.memory_space<smem>>
    %220 = vector.broadcast %219 : f32 to vector<1x128xf32>
    %221 = arith.mulf %196, %220 : vector<1x128xf32>
    %222 = arith.addf %218, %221 : vector<1x128xf32>
    %c1_115 = arith.constant 1 : index
    %223 = memref.load %arg6[%c1_115] : memref<2xf32, #tpu.memory_space<smem>>
    %224 = vector.broadcast %223 : f32 to vector<1x128xf32>
    %225 = arith.addf %222, %224 : vector<1x128xf32>
    %c1_116 = arith.constant 1 : index
    %c0_117 = arith.constant 0 : index
    %226 = vector.load %arg8[%c1_116, %c0_117] : memref<2x128xf32, #tpu.memory_space<vmem>>, vector<1x128xf32>
    tpu.vector_store %arg8[%c1_116, %c0_117], %225 {strides = array<i32>} : memref<2x128xf32, #tpu.memory_space<vmem>>, vector<1x128xf32>,
    return
  }
  func.func @transform_0(%arg0: i32) -> (i32, i32) {
    %c0_i32 = arith.constant 0 : i32
    %c0_i32_0 = arith.constant 0 : i32
    %c0_i32_1 = arith.constant 0 : i32
    return %c0_i32, %c0_i32_0 : i32, i32
  }
  func.func @transform_1(%arg0: i32) -> i32 {
    %c0_i32 = arith.constant 0 : i32
    %c0_i32_0 = arith.constant 0 : i32
    return %c0_i32 : i32
  }
  func.func @transform_2(%arg0: i32) -> (i32, i32) {
    %c0_i32 = arith.constant 0 : i32
    %c0_i32_0 = arith.constant 0 : i32
    %c0_i32_1 = arith.constant 0 : i32
    return %c0_i32, %c0_i32_0 : i32, i32
  }
  func.func @transform_3(%arg0: i32) -> i32 {
    %c0_i32 = arith.constant 0 : i32
    %c0_i32_0 = arith.constant 0 : i32
    return %c0_i32 : i32
  }
  func.func @transform_4(%arg0: i32) -> (i32, i32) {
    %c0_i32 = arith.constant 0 : i32
    %c0_i32_0 = arith.constant 0 : i32
    %c0_i32_1 = arith.constant 0 : i32
    return %c0_i32, %c0_i32_0 : i32, i32
  }
  func.func @transform_5(%arg0: i32) -> i32 {
    %c0_i32 = arith.constant 0 : i32
    %c0_i32_0 = arith.constant 0 : i32
    return %c0_i32 : i32
  }
  func.func @transform_6(%arg0: i32) -> (i32, i32) {
    %c0_i32 = arith.constant 0 : i32
    %c0_i32_0 = arith.constant 0 : i32
    return %c0_i32, %arg0 : i32, i32
  }
  func.func @transform_7(%arg0: i32) -> (i32, i32) {
    %c0_i32 = arith.constant 0 : i32
    %c0_i32_0 = arith.constant 0 : i32
    return %c0_i32, %arg0 : i32, i32
  }
}

</mosaic_0001>

<bundles_post_ra>
// kernel: tpu_custom_call.1
= control target key start
LH: loop header
LB: loop body
LE: loop exit
PB: predicated region body
PF: predicated region fallthrough
CT: control target
= control target key end

     0   :  { %12 = vsyncpa [#allocation5], 0  ;;  %s655_s0 = inlined_call_operand.vmem [shape: f32[5,5], index: 0, kind: input, shape index: {}]   ;;  %s656_s1 = inlined_call_operand.vmem [shape: f32[5], index: 1, kind: input, shape index: {}]   ;;  %s657_s2 = inlined_call_operand.vmem [shape: f32[5,3], index: 2, kind: input, shape index: {}]   ;;  %s658_s3 = inlined_call_operand.hbm [shape: f32[3], index: 3, kind: input, shape index: {}]   ;;  %s659_s4 = inlined_call_operand.vmem [shape: f32[3,2], index: 4, kind: input, shape index: {}]   ;;  %s660_s5 = inlined_call_operand.vmem [shape: f32[2], index: 5, kind: input, shape index: {}]   ;;  %s661_s6 = inlined_call_operand.vmem [shape: f32[5,128], index: 6, kind: input, shape index: {}]   ;;  %s662_s7 = inlined_call_operand.hbm [shape: f32[2,128], index: 7, kind: output, shape index: {}]  }
   0x1   :  { %13 = vsyncpa [#allocation7], 0 }
   0x2   :  { %14 = vsyncpa [#allocation4], 0 }
   0x3   :  { %15 = vsyncpa [#allocation11], 0  ;;  %s33_s26 = sshll.u32 %s656_s1, 4  ;;  %s34_s26 = int_to_ptr.vmem [resolvable:$true] %s33_s26 }
   0x4   :  { %16 = vsyncpa [#allocation3], 0  ;;  %s61_s29 = sshll.u32 %s659_s4, 4  ;;  %s390_s30 = scalar_lea.vmem %s34_s26, 16  ;;  %s62_s29 = int_to_ptr.vmem [resolvable:$true] %s61_s29 }
   0x5   :  { %p391_p0 = scmp.ne.s32.totalorder %s34_s26, %s390_s30  ;;  %p395_p1 = scmp.lt.s32.totalorder %s34_s26, %s34_s26 }
   0x6   :  { %p396_p2 = scmp.lt.s32.totalorder %s390_s30, %s390_s30 }
   0x8   :  { %p397_p3 = por %p396_p2, %p395_p1 }
   0xa   :  { %p398_p4 = pnand %p397_p3, %p391_p0 }
   0xc   :  { %401 = shalt.err (!%p398_p4)
}
   0xd   :  { %s488_s8 = smov [#allocation6]   ;;  %s402_s9 = scalar_lea.vmem %s62_s29, 64 }
   0xe   :  { %36 = dma.vmem_to_smem %s34_s26, 16, %s488_s8, [#allocation7]  }
   0xf   :  { %p403_p5 = scmp.ne.s32.totalorder %s62_s29, %s402_s9  ;;  %p407_p6 = scmp.lt.s32.totalorder %s62_s29, %s62_s29 }
  0x10   :  { %p408_p7 = scmp.lt.s32.totalorder %s402_s9, %s402_s9 }
  0x12   :  { %p409_p8 = por %p408_p7, %p407_p6 }
  0x14   :  { %p410_p9 = pnand %p409_p8, %p403_p5 }
  0x16   :  { %413 = shalt.err (!%p410_p9)
}
  0x17   :  { %s489_s1 = smov [#allocation10]   ;;  %s23_s11 = sshll.u32 %s655_s0, 4  ;;  %s24_s11 = int_to_ptr.vmem [resolvable:$true] %s23_s11 }
  0x18   :  { %64 = dma.vmem_to_smem %s62_s29, 64, %s489_s1, [#allocation11]  }
  0x19   :  { %s43_s14 = sshll.u32 %s657_s2, 4  ;;  %s414_s15 = scalar_lea.vmem %s24_s11, 128  ;;  %s44_s14 = int_to_ptr.vmem [resolvable:$true] %s43_s14 }
  0x1a   :  { %p415_p10 = scmp.ne.s32.totalorder %s24_s11, %s414_s15  ;;  %p419_p11 = scmp.lt.s32.totalorder %s24_s11, %s24_s11 }
  0x1b   :  { %p420_p12 = scmp.lt.s32.totalorder %s414_s15, %s414_s15 }
  0x1d   :  { %p421_p13 = por %p420_p12, %p419_p11 }
  0x1f   :  { %p422_p0 = pnand %p421_p13, %p415_p10 }
  0x21   :  { %425 = shalt.err (!%p422_p0)
}
  0x22   :  { %s490_s16 = smov [#allocation2]   ;;  %s426_s17 = scalar_lea.vmem %s44_s14, 128 }
  0x23   :  { %26 = dma.vmem_to_smem %s24_s11, 128, %s490_s16, [#allocation5]  }
  0x24   :  { %p427_p1 = scmp.ne.s32.totalorder %s44_s14, %s426_s17  ;;  %p431_p2 = scmp.lt.s32.totalorder %s44_s14, %s44_s14 }
  0x25   :  { %p432_p3 = scmp.lt.s32.totalorder %s426_s17, %s426_s17 }
  0x27   :  { %p433_p4 = por %p432_p3, %p431_p2 }
  0x29   :  { %p434_p5 = pnand %p433_p4, %p427_p1 }
  0x2b   :  { %437 = shalt.err (!%p434_p5)
}
  0x2c   :  { %s491_s0 = smov [#allocation8]   ;;  %s71_s19 = sshll.u32 %s660_s5, 4  ;;  %s72_s19 = int_to_ptr.vmem [resolvable:$true] %s71_s19 }
  0x2d   :  { %46 = dma.vmem_to_smem %s44_s14, 128, %s491_s0, [#allocation7]  }
  0x2e   :  { %s492_s20 = smov [#allocation9]   ;;  %s446_s23 = scalar_lea.vmem %s72_s19, 16 }
  0x2f   :  { %54 = dma.hbm_to_smem %s658_s3, 16, %s492_s20, [#allocation4]  }
  0x30   :  { %p447_p6 = scmp.ne.s32.totalorder %s72_s19, %s446_s23  ;;  %p451_p7 = scmp.lt.s32.totalorder %s72_s19, %s72_s19 }
  0x31   :  { %p452_p8 = scmp.lt.s32.totalorder %s446_s23, %s446_s23 }
  0x33   :  { %p453_p9 = por %p452_p8, %p451_p7 }
  0x35   :  { %p454_p10 = pnand %p453_p9, %p447_p6 }
  0x37   :  { %457 = shalt.err (!%p454_p10)
}
  0x38   :  { %s493_s24 = smov [#allocation12]  }
  0x39   :  { %74 = dma.vmem_to_smem %s72_s19, 16, %s493_s24, [#allocation11]  }
  0x3a   :  { %478 = dma.done.wait [#allocation5], 128  }
  0x3b   :  { %479 = vsyncadd [#allocation5], 4294967168 }
  0x3c   :  { %480 = dma.done.wait [#allocation7], 144  }
  0x3d   :  { %481 = vsyncadd [#allocation7], 4294967152 }
  0x3e   :  { %482 = dma.done.wait [#allocation4], 16  }
  0x3f   :  { %483 = vsyncadd [#allocation4], 4294967280 }
  0x40   :  { %484 = dma.done.wait [#allocation11], 80  }
  0x41   :  { %485 = vsyncadd [#allocation11], 4294967216 }
  0x42   :  { %95 = sfence }
  0x43   :  { %s101_s3 = sld [smem:[#allocation2]]  ;;  %v556_v0 = vld [vmem:[%s661_s6] sm:$0x1]  ;;  %v563_v1 = vld [vmem:[%s661_s6 + $0x1] sm:$0x1] }
  0x44   :  { %s333_s5 = sld [smem:[#allocation2 + $0x80]]  ;;  %v571_v5 = vld [vmem:[%s661_s6 + $0x2] sm:$0x1]  ;;  %v582_v10 = vld [vmem:[%s661_s6 + $0x3] sm:$0x1] }
  0x45   :  { %s334_s25 = sld [smem:[#allocation2 + $0x100]]  ;;  %v591_v21 = vld [vmem:[%s661_s6 + $0x4] sm:$0x1] }
  0x46   :  { %s335_s26 = sld [smem:[#allocation2 + $0x180]] }
  0x47   :  { %s558_s29 = sld [smem:[#allocation2 + $0x200]] }
  0x48   :  { %s565_s9 = sld [smem:[#allocation6]] }
  0x49   :  { %v102_v2 = vstv %s101_s3  ;;  %s337_s1 = sld [smem:[#allocation2 + $0x1]] }
  0x4a   :  { %v103_v3 = vmul.f32 %v102_v2, %v556_v0  ;;  %v105_v4 = vstv %s333_s5  ;;  %s338_s4 = sld [smem:[#allocation2 + $0x81]] }
  0x4b   :  { %v106_v6 = vmul.f32 %v105_v4, %v563_v1  ;;  %v109_v7 = vstv %s334_s25  ;;  %s339_s12 = sld [smem:[#allocation2 + $0x101]] }
  0x4c   :  { %s340_s13 = sld [smem:[#allocation2 + $0x181]]  ;;  %v110_v9 = vmul.f32 %v109_v7, %v571_v5  ;;  %v113_v11 = vstv %s335_s26 }
  0x4d   :  { %s574_s14 = sld [smem:[#allocation2 + $0x201]]  ;;  %v107_v8 = vadd.f32 %v106_v6, %v103_v3  ;;  %v114_v18 = vmul.f32 %v113_v11, %v582_v10  ;;  %v117_v22 = vstv %s558_s29 }
  0x4e   :  { %s577_s15 = sld [smem:[#allocation6 + $0x1]]  ;;  %v118_v29 = vmul.f32 %v117_v22, %v591_v21  ;;  %v121_v42 = vstv %s565_s9 }
  0x4f   :  { %v125_v12 = vstv %s337_s1  ;;  %s343_s0 = sld [smem:[#allocation2 + $0x2]]  ;;  %v111_v17 = vadd.f32 %v110_v9, %v107_v8 }
  0x50   :  { %v126_v13 = vmul.f32 %v125_v12, %v556_v0  ;;  %v128_v14 = vstv %s338_s4  ;;  %s344_s2 = sld [smem:[#allocation2 + $0x82]] }
  0x51   :  { %v129_v15 = vmul.f32 %v128_v14, %v563_v1  ;;  %v132_v16 = vstv %s339_s12  ;;  %s345_s18 = sld [smem:[#allocation2 + $0x102]]  ;;  %v115_v28 = vadd.f32 %v114_v18, %v111_v17 }
  0x52   :  { %v133_v19 = vmul.f32 %v132_v16, %v571_v5  ;;  %v136_v20 = vstv %s340_s13  ;;  %s346_s19 = sld [smem:[#allocation2 + $0x182]] }
  0x53   :  { %v130_v23 = vadd.f32 %v129_v15, %v126_v13  ;;  %s347_s22 = sld [smem:[#allocation2 + $0x202]]  ;;  %v137_v24 = vmul.f32 %v136_v20, %v582_v10  ;;  %v140_v26 = vstv %s574_s14  ;;  %v119_v41 = vadd.f32 %v118_v29, %v115_v28 }
  0x54   :  { %s595_s23 = sld [smem:[#allocation6 + $0x2]]  ;;  %v141_v35 = vmul.f32 %v140_v26, %v591_v21  ;;  %v144_v49 = vstv %s577_s15 }
  0x55   :  { %v134_v25 = vadd.f32 %v133_v19, %v130_v23  ;;  %v148_v27 = vstv %s343_s0  ;;  %s349_s24 = sld [smem:[#allocation2 + $0x3]]  ;;  %v122_v53 = vadd.f32 %v121_v42, %v119_v41 }
  0x56   :  { %v149_v30 = vmul.f32 %v148_v27, %v556_v0  ;;  %v151_v31 = vstv %s344_s2  ;;  %s350_s6 = sld [smem:[#allocation2 + $0x83]] }
  0x57   :  { %v152_v32 = vmul.f32 %v151_v31, %v563_v1  ;;  %v155_v33 = vstv %s345_s18  ;;  %s351_s3 = sld [smem:[#allocation2 + $0x103]]  ;;  %v138_v34 = vadd.f32 %v137_v24, %v134_v25  ;;  %v618_v7 = vmax.f32 %v122_v53, 0.0 }
  0x58   :  { %v156_v36 = vmul.f32 %v155_v33, %v571_v5  ;;  %v159_v37 = vstv %s346_s19  ;;  %s352_s5 = sld [smem:[#allocation2 + $0x183]] }
  0x59   :  { %v153_v38 = vadd.f32 %v152_v32, %v149_v30  ;;  %v160_v39 = vmul.f32 %v159_v37, %v582_v10  ;;  %v163_v40 = vstv %s347_s22  ;;  %s353_s25 = sld [smem:[#allocation2 + $0x203]]  ;;  %v142_v46 = vadd.f32 %v141_v35, %v138_v34 }
  0x5a   :  { %s604_s26 = sld [smem:[#allocation6 + $0x3]]  ;;  %v164_v44 = vmul.f32 %v163_v40, %v591_v21  ;;  %v167_v54 = vstv %s595_s23 }
  0x5b   :  { %v157_v43 = vadd.f32 %v156_v36, %v153_v38  ;;  %v171_v45 = vstv %s349_s24  ;;  %s355_s27 = sld [smem:[#allocation2 + $0x4]]  ;;  %v145_v61 = vadd.f32 %v144_v49, %v142_v46 }
  0x5c   :  { %v172_v47 = vmul.f32 %v171_v45, %v556_v0  ;;  %v174_v48 = vstv %s350_s6  ;;  %s356_s28 = sld [smem:[#allocation2 + $0x84]] }
  0x5d   :  { %v161_v50 = vadd.f32 %v160_v39, %v157_v43  ;;  %v175_v51 = vmul.f32 %v174_v48, %v563_v1  ;;  %v178_v52 = vstv %s351_s3  ;;  %s357_s29 = sld [smem:[#allocation2 + $0x104]]  ;;  %v621_v12 = vmax.f32 %v145_v61, 0.0 }
  0x5e   :  { %v179_v55 = vmul.f32 %v178_v52, %v571_v5  ;;  %v182_v56 = vstv %s352_s5  ;;  %s358_s30 = sld [smem:[#allocation2 + $0x184]] }
  0x5f   :  { %v165_v57 = vadd.f32 %v164_v44, %v161_v50  ;;  %v176_v58 = vadd.f32 %v175_v51, %v172_v47  ;;  %v183_v59 = vmul.f32 %v182_v56, %v582_v10  ;;  %v186_v60 = vstv %s353_s25  ;;  %s359_s8 = sld [smem:[#allocation2 + $0x204]] }
  0x60   :  { %s614_s9 = sld [smem:[#allocation6 + $0x4]]  ;;  %v187_v63 = vmul.f32 %v186_v60, %v591_v21  ;;  %v190_v13 = vstv %s604_s26 }
  0x61   :  { %v180_v62 = vadd.f32 %v179_v55, %v176_v58  ;;  %v194_v2 = vstv %s355_s27  ;;  %s216_s1 = sld [smem:[#allocation8]]  ;;  %v168_v3 = vadd.f32 %v167_v54, %v165_v57 }
  0x62   :  { %v195_v4 = vmul.f32 %v194_v2, %v556_v0  ;;  %v197_v6 = vstv %s356_s28  ;;  %s361_s4 = sld [smem:[#allocation8 + $0x80]] }
  0x63   :  { %v184_v8 = vadd.f32 %v183_v59, %v180_v62  ;;  %v198_v9 = vmul.f32 %v197_v6, %v563_v1  ;;  %v201_v11 = vstv %s357_s29  ;;  %s362_s10 = sld [smem:[#allocation8 + $0x100]]  ;;  %v169_v19 = vmax.f32 %v168_v3, 0.0  ;;  %s494_s29 = smov [#allocation13]  }
  0x64   :  { %v202_v14 = vmul.f32 %v201_v11, %v571_v5  ;;  %v205_v15 = vstv %s358_s30  ;;  %s363_s11 = sld [smem:[#allocation8 + $0x180]]  ;;  %s321_s30 = sshll.u32 %s494_s29, 4  ;;  %s322_s30 = int_to_ptr.vmem [resolvable:$true] %s321_s30 }
  0x65   :  { %v188_v16 = vadd.f32 %v187_v63, %v184_v8  ;;  %v199_v17 = vadd.f32 %v198_v9, %v195_v4  ;;  %v206_v0 = vmul.f32 %v205_v15, %v582_v10  ;;  %v209_v18 = vstv %s359_s8  ;;  %s626_s12 = sld [smem:[#allocation8 + $0x200]]  ;;  %s458_s8 = scalar_lea.vmem %s322_s30, 32 }
  0x66   :  { %s628_s13 = sld [smem:[#allocation9]]  ;;  %v210_v22 = vmul.f32 %v209_v18, %v591_v21  ;;  %v213_v28 = vstv %s614_s9  ;;  %p459_p11 = scmp.ne.s32.totalorder %s322_s30, %s458_s8 }
  0x67   :  { %v191_v1 = vadd.f32 %v190_v13, %v188_v16  ;;  %v203_v20 = vadd.f32 %v202_v14, %v199_v17  ;;  %v217_v23 = vstv %s216_s1  ;;  %s365_s14 = sld [smem:[#allocation8 + $0x1]]  ;;  %p463_p12 = scmp.lt.s32.totalorder %s322_s30, %s322_s30 }
  0x68   :  { %v218_v5 = vmul.f32 %v217_v23, %v618_v7  ;;  %v220_v24 = vstv %s361_s4  ;;  %s366_s15 = sld [smem:[#allocation8 + $0x81]]  ;;  %p464_p13 = scmp.lt.s32.totalorder %s458_s8, %s458_s8 }
  0x69   :  { %v192_v25 = vmax.f32 %v191_v1, 0.0  ;;  %v207_v26 = vadd.f32 %v206_v0, %v203_v20  ;;  %v221_v10 = vmul.f32 %v220_v24, %v621_v12  ;;  %v224_v27 = vstv %s362_s10  ;;  %s367_s16 = sld [smem:[#allocation8 + $0x101]] }
  0x6a   :  { %v225_v29 = vmul.f32 %v224_v27, %v169_v19  ;;  %v228_v30 = vstv %s363_s11  ;;  %s368_s17 = sld [smem:[#allocation8 + $0x181]]  ;;  %p465_p0 = por %p464_p13, %p463_p12 }
  0x6b   :  { %v211_v31 = vadd.f32 %v210_v22, %v207_v26  ;;  %v222_v32 = vadd.f32 %v221_v10, %v218_v5  ;;  %v229_v21 = vmul.f32 %v228_v30, %v192_v25  ;;  %s369_s0 = sld [smem:[#allocation8 + $0x201]]  ;;  %v232_v36 = vstv %s626_s12 }
  0x6c   :  { %s634_s2 = sld [smem:[#allocation9 + $0x1]]  ;;  %v236_v49 = vstv %s628_s13  ;;  %p466_p1 = pnand %p465_p0, %p459_p11 }
  0x6d   :  { %v214_v33 = vadd.f32 %v213_v28, %v211_v31  ;;  %v226_v34 = vadd.f32 %v225_v29, %v222_v32  ;;  %v240_v35 = vstv %s365_s14  ;;  %s371_s18 = sld [smem:[#allocation8 + $0x2]] }
  0x6e   :  { %v241_v37 = vmul.f32 %v240_v35, %v618_v7  ;;  %v243_v38 = vstv %s366_s15  ;;  %s372_s19 = sld [smem:[#allocation8 + $0x82]] }
  0x6f   :  { %v215_v39 = vmax.f32 %v214_v33, 0.0  ;;  %v230_v40 = vadd.f32 %v229_v21, %v226_v34  ;;  %v244_v41 = vmul.f32 %v243_v38, %v621_v12  ;;  %v247_v42 = vstv %s367_s16  ;;  %s373_s20 = sld [smem:[#allocation8 + $0x102]] }
  0x70   :  { %v248_v43 = vmul.f32 %v247_v42, %v169_v19  ;;  %v251_v44 = vstv %s368_s17  ;;  %s374_s21 = sld [smem:[#allocation8 + $0x182]] }
  0x71   :  { %v233_v45 = vmul.f32 %v232_v36, %v215_v39  ;;  %v245_v46 = vadd.f32 %v244_v41, %v241_v37  ;;  %v252_v47 = vmul.f32 %v251_v44, %v192_v25  ;;  %v255_v48 = vstv %s369_s0  ;;  %s375_s22 = sld [smem:[#allocation8 + $0x202]] }
  0x72   :  { %s640_s23 = sld [smem:[#allocation9 + $0x2]]  ;;  %v256_v52 = vmul.f32 %v255_v48, %v215_v39  ;;  %v259_v60 = vstv %s634_s2 }
  0x73   :  { %v234_v50 = vadd.f32 %v233_v45, %v230_v40  ;;  %v249_v51 = vadd.f32 %v248_v43, %v245_v46  ;;  %v263_v53 = vstv %s371_s18  ;;  %s642_s24 = sld [smem:[#allocation10]] }
  0x74   :  { %v264_v54 = vmul.f32 %v263_v53, %v618_v7  ;;  %v266_v55 = vstv %s372_s19  ;;  %s377_s6 = sld [smem:[#allocation10 + $0x80]] }
  0x75   :  { %v237_v56 = vadd.f32 %v236_v49, %v234_v50  ;;  %v253_v57 = vadd.f32 %v252_v47, %v249_v51  ;;  %v267_v58 = vmul.f32 %v266_v55, %v621_v12  ;;  %v270_v59 = vstv %s373_s20  ;;  %s647_s3 = sld [smem:[#allocation10 + $0x100]] }
  0x76   :  { %v271_v61 = vmul.f32 %v270_v59, %v169_v19  ;;  %v274_v62 = vstv %s374_s21  ;;  %s379_s5 = sld [smem:[#allocation10 + $0x1]] }
  0x77   :  { %v257_v63 = vadd.f32 %v256_v52, %v253_v57  ;;  %v268_v2 = vadd.f32 %v267_v58, %v264_v54  ;;  %v275_v3 = vmul.f32 %v274_v62, %v192_v25  ;;  %v278_v4 = vstv %s375_s22  ;;  %s380_s25 = sld [smem:[#allocation10 + $0x81]] }
  0x78   :  { %v238_v6 = vmax.f32 %v237_v56, 0.0  ;;  %v279_v9 = vmul.f32 %v278_v4, %v215_v39  ;;  %s381_s26 = sld [smem:[#allocation10 + $0x101]]  ;;  %v282_v15 = vstv %s640_s23 }
  0x79   :  { %v260_v7 = vadd.f32 %v259_v60, %v257_v63  ;;  %v272_v8 = vadd.f32 %v271_v61, %v268_v2  ;;  %v286_v11 = vstv %s642_s24  ;;  %s296_s27 = sld [smem:[#allocation12]] }
  0x7a   :  { %v289_v12 = vstv %s377_s6  ;;  %s382_s28 = sld [smem:[#allocation12 + $0x1]]  ;;  %v287_v17 = vmul.f32 %v286_v11, %v238_v6 }
  0x7b   :  { %v261_v13 = vmax.f32 %v260_v7, 0.0  ;;  %v276_v14 = vadd.f32 %v275_v3, %v272_v8  ;;  %v293_v23 = vstv %s647_s3 }
  0x7c   :  { %v301_v18 = vstv %s379_s5 }
  0x7d   :  { %v280_v16 = vadd.f32 %v279_v9, %v276_v14  ;;  %v290_v0 = vmul.f32 %v289_v12, %v261_v13  ;;  %v302_v19 = vmul.f32 %v301_v18, %v238_v6  ;;  %v304_v1 = vstv %s380_s25 }
  0x7e   :  { %v305_v22 = vmul.f32 %v304_v1, %v261_v13  ;;  %v308_v5 = vstv %s381_s26 }
  0x7f   :  { %v283_v20 = vadd.f32 %v282_v15, %v280_v16  ;;  %v291_v25 = vadd.f32 %v290_v0, %v287_v17  ;;  %v297_v28 = vstv %s296_s27 }
  0x80   :  { %v306_v26 = vadd.f32 %v305_v22, %v302_v19  ;;  %v312_v29 = vstv %s382_s28 }
  0x81   :  { %v284_v24 = vmax.f32 %v283_v20, 0.0 }
  0x83   :  { %v294_v10 = vmul.f32 %v293_v23, %v284_v24  ;;  %v309_v27 = vmul.f32 %v308_v5, %v284_v24 }
  0x85   :  { %v295_v30 = vadd.f32 %v294_v10, %v291_v25  ;;  %v310_v31 = vadd.f32 %v309_v27, %v306_v26 }
  0x87   :  { %v298_v32 = vadd.f32 %v297_v28, %v295_v30  ;;  %v313_v21 = vadd.f32 %v312_v29, %v310_v31 }
  0x89   :  { %299 = vst [vmem:[#allocation13] sm:$0x1] %v298_v32  ;;  %314 = vst [vmem:[#allocation13 + $0x1] sm:$0x1] %v313_v21 }
  0x8a   :  { %469 = shalt.err (!%p466_p1)
}
  0x8b   :  { %324 = dma.vmem_to_hbm [thread:$0]  %s322_s30, 32, %s662_s7, [#allocation3]  }
  0x8c   :  { %486 = dma.done.wait [#allocation3], 32  }
  0x8d   :  { %487 = vsyncadd [#allocation3], 4294967264 }
  0x8e   :  { %328 = vsyncpa [#allocation3], 1 }
  0x8f   :  { %329 = vsyncpa [#allocation4], 1 }
  0x90   :  { %330 = vsyncpa [#allocation5], 1 }
  0x91   :  { %331 = vsyncpa [#allocation7], 1 }
  0x92   :  { %332 = vsyncpa [#allocation11], 1 }

</bundles_post_ra>
